<compile_context>
chip_gen: v6e
topology: v6e:2x2x1
jax: 0.10.0
libtpu: 0.0.40
codegen_flags: <defaults>
</compile_context>

<pallas_src>
import functools

import jax
import jax.numpy as jnp
from jax.experimental import pallas as pl
from jax.experimental.pallas import tpu as pltpu

_IN = 784
_H1 = 128
_H2 = 64
_OUT = 10
_OUT_PAD = 128  # lane-dense output width


def mlp_kernel(x_ref, w1_ref, b1_ref, w2_ref, b2_ref, w3_ref, b3_ref, o_ref):
    # Layer 1: Linear(784 -> 128) + ReLU.  bf16 MXU inputs, f32 accumulate.
    h1 = jnp.dot(x_ref[...], w1_ref[...], preferred_element_type=jnp.float32)
    h1 = jnp.maximum(h1 + b1_ref[...], 0.0)
    # Layer 2: Linear(128 -> 64) + ReLU.
    h2 = jnp.dot(h1.astype(w2_ref.dtype), w2_ref[...],
                 preferred_element_type=jnp.float32)
    h2 = jnp.maximum(h2 + b2_ref[...], 0.0)
    # Output layer: Linear(64 -> 128 padded), no activation.  Columns 10..127
    # of w3/b3 are zero, so logits beyond column 9 are exactly 0 and get
    # sliced off in the wrapper.
    out = jnp.dot(h2.astype(w3_ref.dtype), w3_ref[...],
                  preferred_element_type=jnp.float32)
    o_ref[...] = (out + b3_ref[...]).astype(o_ref.dtype)


def _round_up(n, m):
    return (n + m - 1) // m * m


@functools.partial(jax.jit, static_argnames=("block_b",))
def digit_classifier(x, w1, b1, w2, b2, w3, b3, *, block_b=512):
    """Pallas forward pass of Digit_Classifier.

    x:  (B, 784) float32
    w1: (784, 128), b1: (1, 128)
    w2: (128, 64),  b2: (1, 64)
    w3: (64, 10),   b3: (1, 10)
    returns: (B, 10) float32 logits
    """
    B = x.shape[0]
    # Batch tile: multiple of 8 (sublane), capped at block_b (fits v5e's 16 MiB
    # scoped VMEM with room to spare in bf16, and v7x's 32 MiB scoped default).
    TB = min(block_b, _round_up(B, 8))
    B_pad = _round_up(B, TB)
    if B_pad != B:
        x = jnp.pad(x, ((0, B_pad - B), (0, 0)))

    # Lane-dense output: zero-pad the last layer from 10 -> 128 columns.
    w3p = jnp.pad(w3, ((0, 0), (0, _OUT_PAD - w3.shape[1])))
    b3p = jnp.pad(b3, ((0, 0), (0, _OUT_PAD - b3.shape[1])))

    # bf16 for HBM traffic + MXU inputs; biases stay f32 (f32 epilogue).
    xb = x.astype(jnp.bfloat16)
    w1b = w1.astype(jnp.bfloat16)
    w2b = w2.astype(jnp.bfloat16)
    w3b = w3p.astype(jnp.bfloat16)

    grid = (B_pad // TB,)

    flops = 2 * B_pad * (_IN * _H1 + _H1 * _H2 + _H2 * _OUT_PAD)
    bytes_accessed = (
        B_pad * _IN * 2                       # x (bf16)
        + (_IN * _H1 + _H1 * _H2 + _H2 * _OUT_PAD) * 2   # weights (bf16)
        + (_H1 + _H2 + _OUT_PAD) * 4          # biases (f32)
        + B_pad * _OUT_PAD * 4                # output (f32)
    )

    out = pl.pallas_call(
        mlp_kernel,
        out_shape=jax.ShapeDtypeStruct((B_pad, _OUT_PAD), jnp.float32),
        grid_spec=pltpu.PrefetchScalarGridSpec(
            num_scalar_prefetch=0,
            grid=grid,
            in_specs=[
                # x: tiled over the batch (double-buffered by the pipeline).
                pl.BlockSpec((TB, _IN), lambda i: (i, 0)),
                # Weights / biases: full-array blocks, resident across steps.
                pl.BlockSpec((_IN, _H1), lambda i: (0, 0)),
                pl.BlockSpec((1, _H1), lambda i: (0, 0)),
                pl.BlockSpec((_H1, _H2), lambda i: (0, 0)),
                pl.BlockSpec((1, _H2), lambda i: (0, 0)),
                pl.BlockSpec((_H2, _OUT_PAD), lambda i: (0, 0)),
                pl.BlockSpec((1, _OUT_PAD), lambda i: (0, 0)),
            ],
            out_specs=pl.BlockSpec((TB, _OUT_PAD), lambda i: (i, 0)),
        ),
        compiler_params=pltpu.CompilerParams(
            dimension_semantics=("parallel",),
        ),
        cost_estimate=pl.CostEstimate(
            flops=flops, transcendentals=0, bytes_accessed=bytes_accessed),
    )(xb, w1b, b1, w2b, b2, w3b, b3p)

    return out[:B, :_OUT]


def _init_linear(key, in_f, out_f):
    # Deterministic init mimicking torch.nn.Linear default (uniform +/- 1/sqrt(in)).
    kw, kb = jax.random.split(key)
    bound = 1.0 / jnp.sqrt(jnp.float32(in_f))
    w = jax.random.uniform(kw, (in_f, out_f), jnp.float32, -bound, bound)
    b = jax.random.uniform(kb, (1, out_f), jnp.float32, -bound, bound)
    return w, b


if __name__ == "__main__":
    key = jax.random.PRNGKey(0)
    kx, k1, k2, k3 = jax.random.split(key, 4)

    # Small demo batch, deliberately NOT a multiple of 8 to exercise padding.
    B = 6
    x = jax.random.normal(kx, (B, _IN), jnp.float32)
    w1, b1 = _init_linear(k1, _IN, _H1)
    w2, b2 = _init_linear(k2, _H1, _H2)
    w3, b3 = _init_linear(k3, _H2, _OUT)

    out = digit_classifier(x, w1, b1, w2, b2, w3, b3)
    out = jax.block_until_ready(out)

    # Pure-JAX reference using the same bf16-cast inputs the kernel consumes
    # (f32 accumulation), so the comparison is tight.
    xf = x.astype(jnp.bfloat16).astype(jnp.float32)
    w1f = w1.astype(jnp.bfloat16).astype(jnp.float32)
    w2f = w2.astype(jnp.bfloat16).astype(jnp.float32)
    w3f = w3.astype(jnp.bfloat16).astype(jnp.float32)
    ref = jnp.maximum(xf @ w1f + b1, 0.0)
    ref = jnp.maximum(ref.astype(jnp.bfloat16).astype(jnp.float32) @ w2f + b2, 0.0)
    ref = ref.astype(jnp.bfloat16).astype(jnp.float32) @ w3f + b3

    assert out.shape == (B, _OUT)
    assert jnp.allclose(out, ref, atol=1e-2, rtol=1e-2), (
        float(jnp.max(jnp.abs(out - ref))))
    # Sanity vs. full-f32 math (bf16 quantization error only).
    ref32 = jnp.maximum(x @ w1 + b1, 0.0)
    ref32 = jnp.maximum(ref32 @ w2 + b2, 0.0)
    ref32 = ref32 @ w3 + b3
    assert jnp.allclose(out, ref32, atol=5e-2, rtol=5e-2)

    print("KERNEL_OK")
</pallas_src>

<mosaic_0001>
module attributes {stable_mosaic.version = 11 : i64} {
  func.func @mlp_kernel(%arg0: i32, %arg1: memref<8x784xbf16, #tpu.memory_space<vmem>>, %arg2: memref<784x128xbf16, #tpu.memory_space<vmem>>, %arg3: memref<1x128xf32, #tpu.memory_space<vmem>>, %arg4: memref<128x64xbf16, #tpu.memory_space<vmem>>, %arg5: memref<1x64xf32, #tpu.memory_space<vmem>>, %arg6: memref<64x128xbf16, #tpu.memory_space<vmem>>, %arg7: memref<1x128xf32, #tpu.memory_space<vmem>>, %arg8: memref<8x128xf32, #tpu.memory_space<vmem>>) attributes {dimension_semantics = [#tpu.dimension_semantics<parallel>], iteration_bounds = array<i64: 1>, scalar_prefetch = 0 : i64, scratch_operands = 0 : i64, tpu.core_type = #tpu.core_type<tc>, window_params = [{transform_indices = @transform_0, window_bounds = array<i64: 8, 784>}, {pipeline_mode = #tpu.pipeline_mode<synchronous>, transform_indices = @transform_1, window_bounds = array<i64: 784, 128>}, {pipeline_mode = #tpu.pipeline_mode<synchronous>, transform_indices = @transform_2, window_bounds = array<i64: 1, 128>}, {pipeline_mode = #tpu.pipeline_mode<synchronous>, transform_indices = @transform_3, window_bounds = array<i64: 128, 64>}, {pipeline_mode = #tpu.pipeline_mode<synchronous>, transform_indices = @transform_4, window_bounds = array<i64: 1, 64>}, {pipeline_mode = #tpu.pipeline_mode<synchronous>, transform_indices = @transform_5, window_bounds = array<i64: 64, 128>}, {pipeline_mode = #tpu.pipeline_mode<synchronous>, transform_indices = @transform_6, window_bounds = array<i64: 1, 128>}, {transform_indices = @transform_7, window_bounds = array<i64: 8, 128>}]} {
    %c0 = arith.constant 0 : index
    %c0_0 = arith.constant 0 : index
    %0 = vector.load %arg1[%c0, %c0_0] : memref<8x784xbf16, #tpu.memory_space<vmem>>, vector<8x784xbf16>
    %c0_1 = arith.constant 0 : index
    %c0_2 = arith.constant 0 : index
    %1 = vector.load %arg2[%c0_1, %c0_2] : memref<784x128xbf16, #tpu.memory_space<vmem>>, vector<784x128xbf16>
    %cst = arith.constant dense<0.000000e+00> : vector<8x128xf32>
    %2 = tpu.matmul %0, %1, %cst {dimension_numbers = #tpu.dot_dimension_numbers<[1], [0], [0], [1], [0, 0, 1, 1], [], []>} : vector<8x784xbf16>, vector<784x128xbf16>, vector<8x128xf32> -> vector<8x128xf32>
    %c0_3 = arith.constant 0 : index
    %c0_4 = arith.constant 0 : index
    %3 = vector.load %arg3[%c0_3, %c0_4] : memref<1x128xf32, #tpu.memory_space<vmem>>, vector<1x128xf32>
    %4 = vector.broadcast %3 : vector<1x128xf32> to vector<8x128xf32>
    %5 = arith.addf %2, %4 : vector<8x128xf32>
    %cst_5 = arith.constant 0.000000e+00 : f32
    %6 = vector.broadcast %cst_5 : f32 to vector<8x128xf32>
    %7 = arith.maximumf %5, %6 : vector<8x128xf32>
    %8 = arith.truncf %7 : vector<8x128xf32> to vector<8x128xbf16>
    %c0_6 = arith.constant 0 : index
    %c0_7 = arith.constant 0 : index
    %9 = vector.load %arg4[%c0_6, %c0_7] : memref<128x64xbf16, #tpu.memory_space<vmem>>, vector<128x64xbf16>
    %cst_8 = arith.constant dense<0.000000e+00> : vector<8x64xf32>
    %10 = tpu.matmul %8, %9, %cst_8 {dimension_numbers = #tpu.dot_dimension_numbers<[1], [0], [0], [1], [0, 0, 1, 1], [], []>} : vector<8x128xbf16>, vector<128x64xbf16>, vector<8x64xf32> -> vector<8x64xf32>
    %c0_9 = arith.constant 0 : index
    %c0_10 = arith.constant 0 : index
    %11 = vector.load %arg5[%c0_9, %c0_10] : memref<1x64xf32, #tpu.memory_space<vmem>>, vector<1x64xf32>
    %12 = vector.broadcast %11 : vector<1x64xf32> to vector<8x64xf32>
    %13 = arith.addf %10, %12 : vector<8x64xf32>
    %cst_11 = arith.constant 0.000000e+00 : f32
    %14 = vector.broadcast %cst_11 : f32 to vector<8x64xf32>
    %15 = arith.maximumf %13, %14 : vector<8x64xf32>
    %16 = arith.truncf %15 : vector<8x64xf32> to vector<8x64xbf16>
    %c0_12 = arith.constant 0 : index
    %c0_13 = arith.constant 0 : index
    %17 = vector.load %arg6[%c0_12, %c0_13] : memref<64x128xbf16, #tpu.memory_space<vmem>>, vector<64x128xbf16>
    %cst_14 = arith.constant dense<0.000000e+00> : vector<8x128xf32>
    %18 = tpu.matmul %16, %17, %cst_14 {dimension_numbers = #tpu.dot_dimension_numbers<[1], [0], [0], [1], [0, 0, 1, 1], [], []>} : vector<8x64xbf16>, vector<64x128xbf16>, vector<8x128xf32> -> vector<8x128xf32>
    %c0_15 = arith.constant 0 : index
    %c0_16 = arith.constant 0 : index
    %19 = vector.load %arg7[%c0_15, %c0_16] : memref<1x128xf32, #tpu.memory_space<vmem>>, vector<1x128xf32>
    %20 = vector.broadcast %19 : vector<1x128xf32> to vector<8x128xf32>
    %21 = arith.addf %18, %20 : vector<8x128xf32>
    %c0_17 = arith.constant 0 : index
    %c0_18 = arith.constant 0 : index
    %22 = vector.load %arg8[%c0_17, %c0_18] : memref<8x128xf32, #tpu.memory_space<vmem>>, vector<8x128xf32>
    tpu.vector_store %arg8[%c0_17, %c0_18], %21 {strides = array<i32>} : memref<8x128xf32, #tpu.memory_space<vmem>>, vector<8x128xf32>,
    return
  }
  func.func @transform_0(%arg0: i32) -> (i32, i32) {
    %c0_i32 = arith.constant 0 : i32
    %c0_i32_0 = arith.constant 0 : i32
    return %arg0, %c0_i32 : i32, i32
  }
  func.func @transform_1(%arg0: i32) -> (i32, i32) {
    %c0_i32 = arith.constant 0 : i32
    %c0_i32_0 = arith.constant 0 : i32
    %c0_i32_1 = arith.constant 0 : i32
    return %c0_i32, %c0_i32_0 : i32, i32
  }
  func.func @transform_2(%arg0: i32) -> (i32, i32) {
    %c0_i32 = arith.constant 0 : i32
    %c0_i32_0 = arith.constant 0 : i32
    %c0_i32_1 = arith.constant 0 : i32
    return %c0_i32, %c0_i32_0 : i32, i32
  }
  func.func @transform_3(%arg0: i32) -> (i32, i32) {
    %c0_i32 = arith.constant 0 : i32
    %c0_i32_0 = arith.constant 0 : i32
    %c0_i32_1 = arith.constant 0 : i32
    return %c0_i32, %c0_i32_0 : i32, i32
  }
  func.func @transform_4(%arg0: i32) -> (i32, i32) {
    %c0_i32 = arith.constant 0 : i32
    %c0_i32_0 = arith.constant 0 : i32
    %c0_i32_1 = arith.constant 0 : i32
    return %c0_i32, %c0_i32_0 : i32, i32
  }
  func.func @transform_5(%arg0: i32) -> (i32, i32) {
    %c0_i32 = arith.constant 0 : i32
    %c0_i32_0 = arith.constant 0 : i32
    %c0_i32_1 = arith.constant 0 : i32
    return %c0_i32, %c0_i32_0 : i32, i32
  }
  func.func @transform_6(%arg0: i32) -> (i32, i32) {
    %c0_i32 = arith.constant 0 : i32
    %c0_i32_0 = arith.constant 0 : i32
    %c0_i32_1 = arith.constant 0 : i32
    return %c0_i32, %c0_i32_0 : i32, i32
  }
  func.func @transform_7(%arg0: i32) -> (i32, i32) {
    %c0_i32 = arith.constant 0 : i32
    %c0_i32_0 = arith.constant 0 : i32
    return %arg0, %c0_i32 : i32, i32
  }
}

</mosaic_0001>

<bundles_post_ra>
// kernel: digit_classifier.1
= control target key start
LH: loop header
LB: loop body
LE: loop exit
PB: predicated region body
PF: predicated region fallthrough
CT: control target
= control target key end

     0   :  { %v1118_v43 = vmov 0.0   ;;  %vm1119_vm0 = vmmov 0   ;;  %vm455_vm1 = vcmask 130048   ;;  %s1387_s0 = inlined_call_operand.vmem [shape: bf16[8,784], index: 0, kind: input, shape index: {}]   ;;  %s1388_s1 = inlined_call_operand.vmem [shape: bf16[784,128], index: 1, kind: input, shape index: {}]   ;;  %s1389_s2 = inlined_call_operand.vmem [shape: f32[1,128], index: 2, kind: input, shape index: {}]   ;;  %s1390_s3 = inlined_call_operand.vmem [shape: bf16[128,64], index: 3, kind: input, shape index: {}]   ;;  %s1391_s4 = inlined_call_operand.vmem [shape: f32[1,64], index: 4, kind: input, shape index: {}]   ;;  %s1392_s5 = inlined_call_operand.vmem [shape: bf16[64,128], index: 5, kind: input, shape index: {}]   ;;  %s1393_s6 = inlined_call_operand.vmem [shape: f32[1,128], index: 6, kind: input, shape index: {}]   ;;  %s1394_s7 = inlined_call_operand.hbm [shape: f32[8,128], index: 7, kind: output, shape index: {}]  }
   0x1   :  { %v1028_v0 = vld [vmem:[%s1388_s1 + $0x78] sm:$0xff]   ;;  %v1032_v4 = vld [vmem:[%s1388_s1 + $0x70] sm:$0xff]   ;;  %v1036_v8 = vld [vmem:[%s1388_s1 + $0x68] sm:$0xff]  }
   0x2   :  { %v1029_v1 = vld [vmem:[%s1388_s1 + $0x38] sm:$0xff]   ;;  %905 = vmatprep.subr.bf16.mxu0 %v1028_v0  ;;  %v1033_v5 = vld [vmem:[%s1388_s1 + $0x30] sm:$0xff]   ;;  %v1037_v9 = vld [vmem:[%s1388_s1 + $0x28] sm:$0xff]  }
   0x3   :  { %v1030_v2 = vld [vmem:[%s1388_s1 + $0xf8] sm:$0xff]   ;;  %906 = vmatpush3.bf16.msra.mxu0 %v1029_v1  ;;  %v1034_v6 = vld [vmem:[%s1388_s1 + $0xf0] sm:$0xff]   ;;  %v1038_v10 = vld [vmem:[%s1388_s1 + $0xe8] sm:$0xff]  }
   0x4   :  { %v1031_v3 = vld [vmem:[%s1388_s1 + $0xb8] sm:$0xff]   ;;  %927 = vmatprep.subr.bf16.mxu1 %v1030_v2  ;;  %907 = vmatprep.subr.bf16.mxu0 %v1032_v4  ;;  %v1035_v7 = vld [vmem:[%s1388_s1 + $0xb0] sm:$0xff]   ;;  %v1039_v11 = vld [vmem:[%s1388_s1 + $0xa8] sm:$0xff]  }
   0x5   :  { %928 = vmatpush3.bf16.msra.mxu1 %v1031_v3  ;;  %v1040_v12 = vld [vmem:[%s1388_s1 + $0x60] sm:$0xff]   ;;  %v1044_v16 = vld [vmem:[%s1388_s1 + $0x58] sm:$0xff]   ;;  %v1048_v20 = vld [vmem:[%s1388_s1 + $0x50] sm:$0xff]  }
   0x6   :  { %929 = vmatprep.subr.bf16.mxu1 %v1034_v6  ;;  %v1041_v13 = vld [vmem:[%s1388_s1 + $0x20] sm:$0xff]   ;;  %v1045_v17 = vld [vmem:[%s1388_s1 + $0x18] sm:$0xff]   ;;  %v1049_v21 = vld [vmem:[%s1388_s1 + $0x10] sm:$0xff]  }
   0x7   :  { %908 = vmatpush3.bf16.msra.mxu0 %v1033_v5  ;;  %v1042_v14 = vld [vmem:[%s1388_s1 + $0xe0] sm:$0xff]   ;;  %v1046_v18 = vld [vmem:[%s1388_s1 + $0xd8] sm:$0xff]   ;;  %v1050_v22 = vld [vmem:[%s1388_s1 + $0xd0] sm:$0xff]  }
   0x8   :  { %909 = vmatprep.subr.bf16.mxu0 %v1036_v8  ;;  %v1043_v15 = vld [vmem:[%s1388_s1 + $0xa0] sm:$0xff]   ;;  %v1047_v19 = vld [vmem:[%s1388_s1 + $0x98] sm:$0xff]   ;;  %v1051_v23 = vld [vmem:[%s1388_s1 + $0x90] sm:$0xff]  }
   0x9   :  { %930 = vmatpush3.bf16.msra.mxu1 %v1035_v7  ;;  %v1052_v24 = vld [vmem:[%s1388_s1 + $0x48] sm:$0xff]   ;;  %v1056_v28 = vld [vmem:[%s1388_s1 + $0x40] sm:$0xff]   ;;  %v1062_v35 = vld [vmem:[%s1388_s1 + $0x178] sm:$0xff]  }
   0xa   :  { %931 = vmatprep.subr.bf16.mxu1 %v1038_v10  ;;  %v1053_v25 = vld [vmem:[%s1388_s1 + $0x8] sm:$0xff]   ;;  %v1057_v29 = vld [vmem:[%s1388_s1] sm:$0xff]   ;;  %v1065_v39 = vld [vmem:[%s1388_s1 + $0x138] sm:$0xff]  }
   0xb   :  { %910 = vmatpush3.bf16.msra.mxu0 %v1037_v9  ;;  %v1054_v26 = vld [vmem:[%s1388_s1 + $0xc8] sm:$0xff]   ;;  %v1058_v30 = vld [vmem:[%s1388_s1 + $0xc0] sm:$0xff]   ;;  %v1066_v40 = vld [vmem:[%s1388_s1 + $0x170] sm:$0xff]  }
   0xc   :  { %911 = vmatprep.subr.bf16.mxu0 %v1040_v12  ;;  %v1055_v27 = vld [vmem:[%s1388_s1 + $0x88] sm:$0xff]   ;;  %v28_v31 = vld [vmem:[%s1387_s0] sm:$0xff]  ;;  %v1067_v41 = vld [vmem:[%s1388_s1 + $0x130] sm:$0xff]  }
   0xd   :  { %932 = vmatpush3.bf16.msra.mxu1 %v1039_v11  ;;  %v833_v32 = vcombine.low %v28_v31, %v28_v31  ;;  %v834_v33 = vcombine.high %v28_v31, %v28_v31  ;;  %v1061_v34 = vld [vmem:[%s1388_s1 + $0x80] sm:$0xff]   ;;  %v29_v36 = vld [vmem:[%s1387_s0 + $0x8] sm:$0xff]  ;;  %v1072_v47 = vld [vmem:[%s1388_s1 + $0x158] sm:$0xff]  }
   0xe   :  { %933 = vmatprep.subr.bf16.mxu1 %v1042_v14  ;;  %v835_v37 = vcombine.low %v29_v36, %v29_v36  ;;  %v836_v38 = vcombine.high %v29_v36, %v29_v36  ;;  %v1068_v42 = vld [vmem:[%s1388_s1 + $0x168] sm:$0xff]   ;;  %v1070_v45 = vld [vmem:[%s1388_s1 + $0x160] sm:$0xff]   ;;  %v1073_v48 = vld [vmem:[%s1388_s1 + $0x118] sm:$0xff]  }
   0xf   :  { %912 = vmatpush3.bf16.msra.mxu0 %v1041_v13  ;;  %491 = vmatprep.mubr.bf16.mxu0 %v834_v33  ;;  %v1069_v44 = vld [vmem:[%s1388_s1 + $0x128] sm:$0xff]   ;;  %v1071_v46 = vld [vmem:[%s1388_s1 + $0x120] sm:$0xff]   ;;  %v1074_v49 = vld [vmem:[%s1388_s1 + $0x150] sm:$0xff]  }
  0x10   :  { %913 = vmatprep.subr.bf16.mxu0 %v1044_v16  ;;  %531 = vmatprep.mubr.bf16.mxu1 %v836_v38  ;;  %v1080_v50 = vld [vmem:[%s1388_s1 + $0x180] sm:$0xff]   ;;  %v30_v51 = vld [vmem:[%s1387_s0 + $0x10] sm:$0xff]  ;;  %v1083_v54 = vld [vmem:[%s1387_s0 + $0x18] ss:$0 sps:$4 sm:$0xff]  }
  0x11   :  { %934 = vmatpush3.bf16.msra.mxu1 %v1043_v15  ;;  %v1075_v52 = vld [vmem:[%s1388_s1 + $0x110] sm:$0xff]   ;;  %v838_v53 = vcombine.high %v30_v51, %v30_v51  ;;  %v1076_v55 = vld [vmem:[%s1388_s1 + $0x148] sm:$0xff]   ;;  %v1078_v57 = vld [vmem:[%s1388_s1 + $0x140] sm:$0xff]  }
  0x12   :  { %935 = vmatprep.subr.bf16.mxu1 %v1046_v18  ;;  %v1077_v56 = vld [vmem:[%s1388_s1 + $0x108] sm:$0xff]  }
  0x13   :  { %914 = vmatpush3.bf16.msra.mxu0 %v1045_v17 }
  0x14   :  { %915 = vmatprep.subr.bf16.mxu0 %v1048_v20 }
  0x15   :  { %936 = vmatpush3.bf16.msra.mxu1 %v1047_v19 }
  0x16   :  { %937 = vmatprep.subr.bf16.mxu1 %v1050_v22 }
  0x17   :  { %916 = vmatpush3.bf16.msra.mxu0 %v1049_v21 }
  0x18   :  { %917 = vmatprep.subr.bf16.mxu0 %v1052_v24 }
  0x19   :  { %938 = vmatpush3.bf16.msra.mxu1 %v1051_v23 }
  0x1a   :  { %939 = vmatprep.subr.bf16.mxu1 %v1054_v26 }
  0x1b   :  { %918 = vmatpush3.bf16.msra.mxu0 %v1053_v25 }
  0x1c   :  { %919 = vmatprep.subr.bf16.mxu0 %v1056_v28 }
  0x1d   :  { %940 = vmatpush3.bf16.msra.mxu1 %v1055_v27 }
  0x1e   :  { %941 = vmatprep.subr.bf16.mxu1 %v1058_v30 }
  0x1f   :  { %920 = vmatpush3.bf16.msra.mxu0 %v1057_v29 }
  0x20   :  { %949 = vmatprep.subr.bf16.mxu0 %v1062_v35 }
  0x21   :  { %942 = vmatpush3.bf16.msra.mxu1 %v1061_v34 }
  0x22   :  { %492 = vmatmul.mubr.bf16.vlgmr.msra.gmra.mxu0 %v833_v32  ;;  %987 = vmatprep.subr.bf16.mxu1 %v1118_v43 }
  0x23   :  { %950 = vmatpush3.bf16.msra.mxu0 %v1065_v39  ;;  %571 = vmatprep.mubr.bf16.mxu0 %v838_v53 }
  0x24   :  { %532 = vmatmul.mubr.bf16.vlgmr.msra.gmra.mxu1 %v835_v37  ;;  %951 = vmatprep.subr.bf16.mxu0 %v1066_v40 }
  0x25   :  { %989 = vmatprep.mubr.msk.bf16.mxu1 %vm1119_vm0, %v1118_v43  ;;  %988 = vmatpush3.bf16.msra.mxu1 %v1080_v50 }
  0x26   :  { %993 = vmatprep.subr.bf16.mxu1 %v1118_v43 }
  0x27   :  { %952 = vmatpush3.bf16.msra.mxu0 %v1067_v41 }
  0x28   :  { %953 = vmatprep.subr.bf16.mxu0 %v1068_v42 }
  0x2b   :  { %954 = vmatpush3.bf16.msra.mxu0 %v1069_v44 }
  0x2c   :  { %955 = vmatprep.subr.bf16.mxu0 %v1070_v45  ;;  %990 = vmatmul.mubr.msk.bf16.vlgmr.msra.gmra.mxu1 %vm455_vm1, %v1083_v54 }
  0x2d   :  { %1009 = vmatprep.mubr.msk.bf16.mxu1 %vm1119_vm0, %v1118_v43 }
  0x2f   :  { %956 = vmatpush3.bf16.msra.mxu0 %v1071_v46 }
  0x30   :  { %957 = vmatprep.subr.bf16.mxu0 %v1072_v47 }
  0x33   :  { %958 = vmatpush3.bf16.msra.mxu0 %v1073_v48 }
  0x34   :  { %959 = vmatprep.subr.bf16.mxu0 %v1074_v49 }
  0x37   :  { %960 = vmatpush3.bf16.msra.mxu0 %v1075_v52 }
  0x38   :  { %961 = vmatprep.subr.bf16.mxu0 %v1076_v55 }
  0x39   :  { %12 = vsyncpa [#allocation3], 0  ;;  %v1079_v58 = vld [vmem:[%s1388_s1 + $0x100] sm:$0xff]   ;;  %v837_v59 = vcombine.low %v30_v51, %v30_v51  ;;  %v1084_v60 = vld [vmem:[%s1390_s3 + $0x38] sm:$0xff]   ;;  %vm773_vm2 = vcmask 523264   ;;  %s1120_s17 = smov [#allocation2]  }
  0x3a   :  { %994 = vmatpush3.bf16.msra.mxu1 %v1084_v60  ;;  %v1085_v61 = vld [vmem:[%s1390_s3 + $0x30] sm:$0xff]   ;;  %v1086_v62 = vld [vmem:[%s1390_s3 + $0x28] sm:$0xff]   ;;  %v1087_v63 = vld [vmem:[%s1390_s3 + $0x20] sm:$0xff]  }
  0x3b   :  { %962 = vmatpush3.bf16.msra.mxu0 %v1077_v56  ;;  %995 = vmatprep.subr.bf16.mxu1 %v1118_v43  ;;  %v1088_v0 = vld [vmem:[%s1390_s3 + $0x18] sm:$0xff]   ;;  %v1089_v1 = vld [vmem:[%s1390_s3 + $0x10] sm:$0xff]   ;;  %v1090_v2 = vld [vmem:[%s1390_s3 + $0x8] sm:$0xff]  }
  0x3c   :  { %963 = vmatprep.subr.bf16.mxu0 %v1078_v57  ;;  %v1091_v3 = vld [vmem:[%s1390_s3] sm:$0xff]   ;;  %v1092_v4 = vld [vmem:[%s1392_s5 + $0x18] sm:$0xff]   ;;  %v1093_v5 = vld [vmem:[%s1392_s5 + $0x10] sm:$0xff]  }
  0x3d   :  { %v832_v19 = vld [vmem:[%s1389_s2] ss:$0 sm:$0xff]  ;;  %v1094_v32 = vld [vmem:[%s1392_s5 + $0x8] sm:$0xff]  }
  0x3e   :  { %996 = vmatpush3.bf16.msra.mxu1 %v1085_v61  ;;  %v1095_v33 = vld [vmem:[%s1392_s5] sm:$0xff]   ;;  %s824_s5 = sshll.u32 %s1120_s17, 4  ;;  %s825_s5 = int_to_ptr.vmem [resolvable:$true] %s824_s5 }
  0x3f   :  { %964 = vmatpush3.bf16.msra.mxu0 %v1079_v58  ;;  %997 = vmatprep.subr.bf16.mxu1 %v1118_v43  ;;  %v890_v34 = vld [vmem:[%s1391_s4] ss:$0 sm:$0xff]  ;;  %s1096_s4 = scalar_lea.vmem %s825_s5, 128  ;;  %p1101_p1 = scmp.lt.s32.totalorder %s825_s5, %s825_s5 }
  0x40   :  { %1013 = vmatprep.subr.bf16.mxu0 %v1118_v43  ;;  %v899_v42 = vld [vmem:[%s1393_s6] ss:$0 sm:$0xff]  ;;  %p1097_p0 = scmp.ne.s32.totalorder %s825_s5, %s1096_s4  ;;  %p1102_p2 = scmp.lt.s32.totalorder %s1096_s4, %s1096_s4 }
  0x42   :  { %572 = vmatmul.mubr.bf16.vlgmr.msra.gmra.mxu0 %v837_v59  ;;  %998 = vmatpush3.bf16.msra.mxu1 %v1086_v62  ;;  %p1103_p3 = por %p1102_p2, %p1101_p1 }
  0x43   :  { %1021 = vmatprep.mubr.msk.bf16.mxu0 %vm1119_vm0, %v1118_v43  ;;  %999 = vmatprep.subr.bf16.mxu1 %v1118_v43 }
  0x44   :  { %1014 = vmatpush3.bf16.msra.mxu0 %v1092_v4  ;;  %p1104_p4 = pnand %p1103_p3, %p1097_p0 }
  0x45   :  { %1015 = vmatprep.subr.bf16.mxu0 %v1118_v43 }
  0x46   :  { %1000 = vmatpush3.bf16.msra.mxu1 %v1087_v63 }
  0x47   :  { %1001 = vmatprep.subr.bf16.mxu1 %v1118_v43 }
  0x48   :  { %1016 = vmatpush3.bf16.msra.mxu0 %v1093_v5 }
  0x49   :  { %1017 = vmatprep.subr.bf16.mxu0 %v1118_v43 }
  0x4a   :  { %1002 = vmatpush3.bf16.msra.mxu1 %v1088_v0 }
  0x4b   :  { %1003 = vmatprep.subr.bf16.mxu1 %v1118_v43 }
  0x4c   :  { %1018 = vmatpush3.bf16.msra.mxu0 %v1094_v32 }
  0x4d   :  { %1019 = vmatprep.subr.bf16.mxu0 %v1118_v43 }
  0x4e   :  { %1004 = vmatpush3.bf16.msra.mxu1 %v1089_v1 }
  0x4f   :  { %1005 = vmatprep.subr.bf16.mxu1 %v1118_v43 }
  0x50   :  { %1020 = vmatpush3.bf16.msra.mxu0 %v1095_v33 }
  0x52   :  { %1006 = vmatpush3.bf16.msra.mxu1 %v1090_v2 }
  0x53   :  { %1007 = vmatprep.subr.bf16.mxu1 %v1118_v43 }
  0x56   :  { %1008 = vmatpush3.bf16.msra.mxu1 %v1091_v3 }
  0xe2   :  { %v921_v6 = vpop.f32.mrf.mxu0 }
  0xe4   :  { %v922_v7 = vpop.f32.mrf.mxu0  ;;  %v943_v8 = vpop.f32.mrf.mxu1 }
  0xe5   :  { %v923_v18 = vadd.f32 %v922_v7, %v921_v6 }
  0xe6   :  { %v924_v9 = vpop.f32.mrf.mxu0  ;;  %v944_v10 = vpop.f32.mrf.mxu1 }
  0xe7   :  { %v494_v20 = vadd.f32 %v923_v18, %v832_v19  ;;  %v945_v21 = vadd.f32 %v944_v10, %v943_v8 }
  0xe8   :  { %v925_v11 = vpop.f32.mrf.mxu0  ;;  %v946_v12 = vpop.f32.mrf.mxu1 }
  0xe9   :  { %v534_v24 = vadd.f32 %v945_v21, %v494_v20 }
  0xea   :  { %v947_v13 = vpop.f32.mrf.mxu1 }
  0xec   :  { %v613_v14 = vpop.f32.mrf.mxu1 }
  0xee   :  { %v991_v15 = vpop.f32.mrf.mxu1 }
  0xf0   :  { %v616_v16 = vpop.f32.mrf.mxu1 }
  0xf2   :  { %v992_v17 = vpop.f32.mrf.mxu1 }
 0x102   :  { %v965_v22 = vpop.f32.mrf.mxu0 }
 0x104   :  { %v966_v23 = vpop.f32.mrf.mxu0 }
 0x105   :  { %v967_v25 = vadd.f32 %v966_v23, %v965_v22 }
 0x106   :  { %v968_v26 = vpop.f32.mrf.mxu0 }
 0x107   :  { %v574_v27 = vadd.f32 %v967_v25, %v534_v24 }
 0x108   :  { %v969_v28 = vpop.f32.mrf.mxu0 }
 0x109   :  { %v614_v29 = vadd.f32 %v613_v14, %v574_v27 }
 0x10b   :  { %v619_v30 = vmax.f32 %v614_v29, 0.0 }
 0x10d   :  { %v620_v31 = vpack.c.bf16 %v619_v30, %v619_v30 }
 0x10f   :  { %1010 = vmatmul.mubr.bf16.vlgmr.msra.gmra.mxu1 %v620_v31 }
 0x1cf   :  { %v726_v35 = vpop.f32.mrf.mxu1 }
 0x1d0   :  { %v727_v36 = vadd.f32 %v890_v34, %v726_v35 }
 0x1d1   :  { %v1011_v37 = vpop.f32.mrf.mxu1 }
 0x1d2   :  { %v732_v38 = vmax.f32 %v727_v36, 0.0 }
 0x1d3   :  { %v729_v39 = vpop.f32.mrf.mxu1 }
 0x1d4   :  { %v733_v40 = vpack.c.bf16 %v732_v38, %v732_v38 }
 0x1d5   :  { %v1012_v41 = vpop.f32.mrf.mxu1 }
 0x1d6   :  { %1022 = vmatmul.mubr.msk.bf16.vlgmr.msra.gmra.mxu0 %vm773_vm2, %v733_v40 }
 0x296   :  { %v811_v43 = vpop.f32.mrf.mxu0 }
 0x297   :  { %v812_v44 = vadd.f32 %v899_v42, %v811_v43 }
 0x298   :  { %v1023_v45 = vpop.f32.mrf.mxu0 }
 0x299   :  { %817 = vst [vmem:[#allocation2] sm:$0xff] %v812_v44 }
 0x29a   :  { %v814_v46 = vpop.f32.mrf.mxu0 }
 0x29b   :  { %1107 = shalt.err (!%p1104_p4)
}
 0x29c   :  { %827 = dma.vmem_to_hbm [thread:$0]  %s825_s5, 128, %s1394_s7, [#allocation3]   ;;  %v1024_v47 = vpop.f32.mrf.mxu0 }
 0x29d   :  { %1116 = dma.done.wait [#allocation3], 128  }
 0x29e   :  { %1117 = vsyncadd [#allocation3], 4294967168 }
 0x29f   :  { %831 = vsyncpa [#allocation3], 1 }

</bundles_post_ra>
